<compile_context>
chip_gen: v7x
topology: tpu7x:2x2x1
jax: 0.10.0
libtpu: 0.0.40
codegen_flags: <defaults>
</compile_context>

<pallas_src>
import functools

import jax
import jax.numpy as jnp
from jax.experimental import pallas as pl
from jax.experimental.pallas import tpu as pltpu

EPS = 1e-5
SUBLANE = 8
VMEM_LIMIT_BYTES = 40 * 1024 * 1024      # < v7x 64 MiB physical; fine on v5e/v6e
FAST_PATH_F32_BYTES = 4 * 1024 * 1024    # whole-slab fast-path threshold (f32 slab)
TILE_TARGET_BYTES = 4 * 1024 * 1024      # streaming row-tile target per buffer
TILE_MAX_ROWS = 8192


def _round_up(x, m):
    return ((x + m - 1) // m) * m


def _choose_row_tile(n_rows, d, itemsize):
    """~TILE_TARGET_BYTES row tile, multiple of 8, at most one (8-padded) slab."""
    rows = TILE_TARGET_BYTES // max(1, d * itemsize)
    rows = max(SUBLANE, min(TILE_MAX_ROWS, int(rows)))
    rows = max(SUBLANE, (rows // SUBLANE) * SUBLANE)
    return min(rows, _round_up(n_rows, SUBLANE))


# ---------------------------------------------------------------------------
# Fast path: whole (N, D) slab resident in VMEM, one kernel, centered variance.
# ---------------------------------------------------------------------------
def _fused_bn_kernel(x_ref, gamma_ref, beta_ref, o_ref, *, eps):
    x = x_ref[...].astype(jnp.float32)
    mean = jnp.mean(x, axis=0, keepdims=True)
    xc = x - mean
    var = jnp.mean(xc * xc, axis=0, keepdims=True)
    scale = gamma_ref[...] * jax.lax.rsqrt(var + eps)
    shift = beta_ref[...] - mean * scale
    o_ref[...] = (x * scale + shift).astype(o_ref.dtype)


# ---------------------------------------------------------------------------
# Streaming pass 1: per-feature stats -> fused (scale, shift).
# Sequential ("arbitrary") grid over row tiles; shifted sums for stability.
# ---------------------------------------------------------------------------
def _stats_kernel(x_ref, gamma_ref, beta_ref, scale_ref, shift_ref,
                  shift_sc, sum_sc, sumsq_sc, *, n_rows, tile_rows, eps):
    i = pl.program_id(0)
    needs_mask = (n_rows % tile_rows) != 0   # Python bool: only last tile ragged

    x = x_ref[...].astype(jnp.float32)
    if needs_mask:
        row_ids = i * tile_rows + jax.lax.broadcasted_iota(jnp.int32, x.shape, 0)
        valid = row_ids < n_rows
        x = jnp.where(valid, x, 0.0)

    @pl.when(i == 0)
    def _():
        rows0 = float(min(n_rows, tile_rows))
        # Tile-0 mean as per-feature shift -> centered accumulation
        # (avoids E[x^2]-E[x]^2 cancellation).
        shift_sc[...] = jnp.sum(x, axis=0, keepdims=True) * (1.0 / rows0)
        sum_sc[...] = jnp.zeros_like(sum_sc)
        sumsq_sc[...] = jnp.zeros_like(sumsq_sc)

    xc = x - shift_sc[...]
    if needs_mask:
        xc = jnp.where(valid, xc, 0.0)       # masked rows must not contribute
    sum_sc[...] += jnp.sum(xc, axis=0, keepdims=True)
    sumsq_sc[...] += jnp.sum(xc * xc, axis=0, keepdims=True)

    @pl.when(i == pl.num_programs(0) - 1)
    def _():
        inv_n = 1.0 / float(n_rows)          # true row count (padding-free)
        mean_c = sum_sc[...] * inv_n
        var = jnp.maximum(sumsq_sc[...] * inv_n - mean_c * mean_c, 0.0)
        mean = shift_sc[...] + mean_c
        scale = gamma_ref[...] * jax.lax.rsqrt(var + eps)
        scale_ref[...] = scale
        shift_ref[...] = beta_ref[...] - mean * scale


# ---------------------------------------------------------------------------
# Streaming pass 2: y = x * scale + shift (one fma per element).
# ---------------------------------------------------------------------------
def _normalize_kernel(x_ref, scale_ref, shift_ref, o_ref):
    x = x_ref[...].astype(jnp.float32)
    o_ref[...] = (x * scale_ref[...] + shift_ref[...]).astype(o_ref.dtype)


def ts_mlp_batchnorm(x, gamma=None, beta=None, *, affine=True, eps=EPS,
                     row_tile=None, fast_path_max_bytes=FAST_PATH_F32_BYTES):
    """x: (B, L, D); gamma, beta: (D,). Returns (B, L, D)."""
    B, L, D = x.shape
    N = B * L

    if not affine or gamma is None:
        gamma = jnp.ones((D,), jnp.float32)
    if not affine or beta is None:
        beta = jnp.zeros((D,), jnp.float32)

    x2d = x.reshape(N, D)
    gamma2d = jnp.asarray(gamma, jnp.float32).reshape(1, D)
    beta2d = jnp.asarray(beta, jnp.float32).reshape(1, D)

    # ---- Fast path: slab resident in VMEM (1 HBM read + 1 HBM write) ----
    if N * D * 4 <= fast_path_max_bytes:
        out2d = pl.pallas_call(
            functools.partial(_fused_bn_kernel, eps=eps),
            out_shape=jax.ShapeDtypeStruct((N, D), x.dtype),
            grid_spec=pltpu.PrefetchScalarGridSpec(
                num_scalar_prefetch=0,
                grid=(1,),
                in_specs=[
                    pl.BlockSpec((N, D), lambda i: (0, 0)),
                    pl.BlockSpec((1, D), lambda i: (0, 0)),
                    pl.BlockSpec((1, D), lambda i: (0, 0)),
                ],
                out_specs=pl.BlockSpec((N, D), lambda i: (0, 0)),
            ),
            compiler_params=pltpu.CompilerParams(
                dimension_semantics=("arbitrary",),
                vmem_limit_bytes=VMEM_LIMIT_BYTES),
        )(x2d, gamma2d, beta2d)
        return out2d.reshape(B, L, D)

    # ---- Streaming path: two passes over ~4 MiB row tiles ----
    itemsize = jnp.dtype(x.dtype).itemsize
    tn = int(row_tile) if row_tile is not None else _choose_row_tile(N, D, itemsize)
    tn = max(SUBLANE, (tn // SUBLANE) * SUBLANE)
    num_tiles = (N + tn - 1) // tn

    # Pass 1: per-feature statistics -> fused (scale, shift).
    scale, shift = pl.pallas_call(
        functools.partial(_stats_kernel, n_rows=N, tile_rows=tn, eps=eps),
        out_shape=(jax.ShapeDtypeStruct((1, D), jnp.float32),
                   jax.ShapeDtypeStruct((1, D), jnp.float32)),
        grid_spec=pltpu.PrefetchScalarGridSpec(
            num_scalar_prefetch=0,
            grid=(num_tiles,),
            in_specs=[
                pl.BlockSpec((tn, D), lambda i: (i, 0)),
                pl.BlockSpec((1, D), lambda i: (0, 0)),
                pl.BlockSpec((1, D), lambda i: (0, 0)),
            ],
            out_specs=(
                pl.BlockSpec((1, D), lambda i: (0, 0)),
                pl.BlockSpec((1, D), lambda i: (0, 0)),
            ),
            scratch_shapes=[
                pltpu.VMEM((1, D), jnp.float32),   # tile-0 shift
                pltpu.VMEM((1, D), jnp.float32),   # running centered sum
                pltpu.VMEM((1, D), jnp.float32),   # running centered sum-of-squares
            ],
        ),
        compiler_params=pltpu.CompilerParams(
            dimension_semantics=("arbitrary",),     # sequential reduction axis
            vmem_limit_bytes=VMEM_LIMIT_BYTES),
    )(x2d, gamma2d, beta2d)

    # Pass 2: normalize (independent row tiles; "parallel" -> megacore on v7x).
    out2d = pl.pallas_call(
        _normalize_kernel,
        out_shape=jax.ShapeDtypeStruct((N, D), x.dtype),
        grid_spec=pltpu.PrefetchScalarGridSpec(
            num_scalar_prefetch=0,
            grid=(num_tiles,),
            in_specs=[
                pl.BlockSpec((tn, D), lambda i: (i, 0)),
                pl.BlockSpec((1, D), lambda i: (0, 0)),
                pl.BlockSpec((1, D), lambda i: (0, 0)),
            ],
            out_specs=pl.BlockSpec((tn, D), lambda i: (i, 0)),
        ),
        compiler_params=pltpu.CompilerParams(
            dimension_semantics=("parallel",),
            vmem_limit_bytes=VMEM_LIMIT_BYTES),
    )(x2d, scale, shift)

    return out2d.reshape(B, L, D)


def _reference(x, gamma, beta, eps=EPS):
    # Pure-JAX reference mirroring torch.nn.BatchNorm1d (training, biased var).
    B, L, D = x.shape
    xf = x.astype(jnp.float32).reshape(B * L, D)
    mean = jnp.mean(xf, axis=0, keepdims=True)
    var = jnp.mean((xf - mean) ** 2, axis=0, keepdims=True)
    y = (xf - mean) / jnp.sqrt(var + eps)
    y = y * gamma[None, :] + beta[None, :]
    return y.reshape(B, L, D).astype(x.dtype)


# TODO(synk): running_mean / running_var buffer updates (training-time side
# effect of nn.BatchNorm1d) are not produced; only the normalized output is.

if __name__ == "__main__":
    key = jax.random.PRNGKey(0)
    kx, kg, kb, kx2 = jax.random.split(key, 4)

    # 1) Small module-consistent case (batch=2, seq=8, n_dims=32): fast path.
    B, L, D = 2, 8, 32
    x = jax.random.normal(kx, (B, L, D), dtype=jnp.float32)
    gamma = jnp.ones((D,), jnp.float32) + 0.1 * jax.random.normal(kg, (D,), jnp.float32)
    beta = 0.1 * jax.random.normal(kb, (D,), jnp.float32)
    out = jax.block_until_ready(ts_mlp_batchnorm(x, gamma, beta, affine=True))
    ref = _reference(x, gamma, beta)
    assert out.shape == (B, L, D)
    assert jnp.allclose(out, ref, atol=1e-5, rtol=1e-5), \
        float(jnp.max(jnp.abs(out - ref)))

    # 2) Streaming path: multiple row tiles, ragged last tile (N % tile != 0),
    #    non-128 feature width (D=72), N not a multiple of 8.
    B2, L2, D2 = 3, 521, 72
    x2 = jax.random.normal(kx2, (B2, L2, D2), dtype=jnp.float32) * 2.0 + 0.5
    g2 = jnp.linspace(0.5, 1.5, D2, dtype=jnp.float32)
    b2 = jnp.linspace(-0.3, 0.3, D2, dtype=jnp.float32)
    out2 = jax.block_until_ready(
        ts_mlp_batchnorm(x2, g2, b2, affine=True,
                         row_tile=128, fast_path_max_bytes=0))
    ref2 = _reference(x2, g2, b2)
    assert out2.shape == (B2, L2, D2)
    assert jnp.allclose(out2, ref2, atol=1e-4, rtol=1e-4), \
        float(jnp.max(jnp.abs(out2 - ref2)))

    # 3) Streaming path with auto tile size (single ragged tile, masked rows).
    out3 = jax.block_until_ready(
        ts_mlp_batchnorm(x2, g2, b2, affine=True, fast_path_max_bytes=0))
    assert jnp.allclose(out3, ref2, atol=1e-4, rtol=1e-4), \
        float(jnp.max(jnp.abs(out3 - ref2)))

    print("KERNEL_OK")
</pallas_src>

<mosaic_0001>
module attributes {stable_mosaic.version = 11 : i64} {
  func.func @_fused_bn_kernel(%arg0: i32, %arg1: memref<16x32xf32, #tpu.memory_space<vmem>>, %arg2: memref<1x32xf32, #tpu.memory_space<vmem>>, %arg3: memref<1x32xf32, #tpu.memory_space<vmem>>, %arg4: memref<16x32xf32, #tpu.memory_space<vmem>>) attributes {dimension_semantics = [#tpu.dimension_semantics<arbitrary>], iteration_bounds = array<i64: 1>, scalar_prefetch = 0 : i64, scratch_operands = 0 : i64, tpu.core_type = #tpu.core_type<tc>, window_params = [{pipeline_mode = #tpu.pipeline_mode<synchronous>, transform_indices = @transform_0, window_bounds = array<i64: 16, 32>}, {pipeline_mode = #tpu.pipeline_mode<synchronous>, transform_indices = @transform_1, window_bounds = array<i64: 1, 32>}, {pipeline_mode = #tpu.pipeline_mode<synchronous>, transform_indices = @transform_2, window_bounds = array<i64: 1, 32>}, {pipeline_mode = #tpu.pipeline_mode<synchronous>, transform_indices = @transform_3, window_bounds = array<i64: 16, 32>}]} {
    %c0 = arith.constant 0 : index
    %c0_0 = arith.constant 0 : index
    %0 = vector.load %arg1[%c0, %c0_0] : memref<16x32xf32, #tpu.memory_space<vmem>>, vector<16x32xf32>
    %cst = arith.constant dense<0.000000e+00> : vector<32xf32>
    %1 = vector.multi_reduction <add>, %0, %cst [0] : vector<16x32xf32> to vector<32xf32>
    %2 = vector.shape_cast %1 : vector<32xf32> to vector<1x32xf32>
    %cst_1 = arith.constant 1.600000e+01 : f32
    %3 = vector.broadcast %cst_1 : f32 to vector<1x32xf32>
    %4 = arith.divf %2, %3 : vector<1x32xf32>
    %5 = vector.broadcast %4 : vector<1x32xf32> to vector<16x32xf32>
    %6 = arith.subf %0, %5 : vector<16x32xf32>
    %7 = arith.mulf %6, %6 : vector<16x32xf32>
    %cst_2 = arith.constant dense<0.000000e+00> : vector<32xf32>
    %8 = vector.multi_reduction <add>, %7, %cst_2 [0] : vector<16x32xf32> to vector<32xf32>
    %9 = vector.shape_cast %8 : vector<32xf32> to vector<1x32xf32>
    %cst_3 = arith.constant 1.600000e+01 : f32
    %10 = vector.broadcast %cst_3 : f32 to vector<1x32xf32>
    %11 = arith.divf %9, %10 : vector<1x32xf32>
    %c0_4 = arith.constant 0 : index
    %c0_5 = arith.constant 0 : index
    %12 = vector.load %arg2[%c0_4, %c0_5] : memref<1x32xf32, #tpu.memory_space<vmem>>, vector<1x32xf32>
    %cst_6 = arith.constant 9.99999974E-6 : f32
    %13 = vector.broadcast %cst_6 : f32 to vector<1x32xf32>
    %14 = arith.addf %11, %13 : vector<1x32xf32>
    %15 = math.rsqrt %14 : vector<1x32xf32>
    %16 = arith.mulf %12, %15 : vector<1x32xf32>
    %c0_7 = arith.constant 0 : index
    %c0_8 = arith.constant 0 : index
    %17 = vector.load %arg3[%c0_7, %c0_8] : memref<1x32xf32, #tpu.memory_space<vmem>>, vector<1x32xf32>
    %18 = arith.mulf %4, %16 : vector<1x32xf32>
    %19 = arith.subf %17, %18 : vector<1x32xf32>
    %20 = vector.broadcast %16 : vector<1x32xf32> to vector<16x32xf32>
    %21 = arith.mulf %0, %20 : vector<16x32xf32>
    %22 = vector.broadcast %19 : vector<1x32xf32> to vector<16x32xf32>
    %23 = arith.addf %21, %22 : vector<16x32xf32>
    %c0_9 = arith.constant 0 : index
    %c0_10 = arith.constant 0 : index
    %24 = vector.load %arg4[%c0_9, %c0_10] : memref<16x32xf32, #tpu.memory_space<vmem>>, vector<16x32xf32>
    tpu.vector_store %arg4[%c0_9, %c0_10], %23 {strides = array<i32>} : memref<16x32xf32, #tpu.memory_space<vmem>>, vector<16x32xf32>,
    return
  }
  func.func @transform_0(%arg0: i32) -> (i32, i32) {
    %c0_i32 = arith.constant 0 : i32
    %c0_i32_0 = arith.constant 0 : i32
    %c0_i32_1 = arith.constant 0 : i32
    return %c0_i32, %c0_i32_0 : i32, i32
  }
  func.func @transform_1(%arg0: i32) -> (i32, i32) {
    %c0_i32 = arith.constant 0 : i32
    %c0_i32_0 = arith.constant 0 : i32
    %c0_i32_1 = arith.constant 0 : i32
    return %c0_i32, %c0_i32_0 : i32, i32
  }
  func.func @transform_2(%arg0: i32) -> (i32, i32) {
    %c0_i32 = arith.constant 0 : i32
    %c0_i32_0 = arith.constant 0 : i32
    %c0_i32_1 = arith.constant 0 : i32
    return %c0_i32, %c0_i32_0 : i32, i32
  }
  func.func @transform_3(%arg0: i32) -> (i32, i32) {
    %c0_i32 = arith.constant 0 : i32
    %c0_i32_0 = arith.constant 0 : i32
    %c0_i32_1 = arith.constant 0 : i32
    return %c0_i32, %c0_i32_0 : i32, i32
  }
}

</mosaic_0001>

<bundles_post_ra>
// kernel: tpu_custom_call.1
= control target key start
LH: loop header
LB: loop body
LE: loop exit
PB: predicated region body
PF: predicated region fallthrough
CT: control target
= control target key end

     0   :  { %8 = vsyncpa [#allocation3], 0  ;;  %s219_s0 = inlined_call_operand.hbm [shape: f32[16,32], index: 0, kind: input, shape index: {}]   ;;  %s220_s1 = inlined_call_operand.vmem [shape: f32[1,32], index: 1, kind: input, shape index: {}]   ;;  %s221_s2 = inlined_call_operand.vmem [shape: f32[1,32], index: 2, kind: input, shape index: {}]   ;;  %s222_s3 = inlined_call_operand.hbm [shape: f32[16,32], index: 3, kind: output, shape index: {}]  }
   0x1   :  { %9 = vsyncpa [#allocation4], 0  ;;  %s153_s12 = smov [#allocation2]   ;;  %s105_s16 = scalar_lea.hbm %s219_s0, 256 }
   0x2   :  { %s15_s13 = sshll.u32 %s153_s12, 4  ;;  %p106_p0 = scmp.ne.s32.totalorder %s219_s0, %s105_s16  ;;  %s16_s13 = int_to_ptr.vmem [resolvable:$true] %s15_s13 }
   0x3   :  { %p109_p1 = scmp.lt.u32.totalorder %s105_s16, %s219_s0 }
   0x5   :  { %p111_p2 = pnand %p109_p1, %p106_p0 }
   0x7   :  { %114 = shalt.err (!%p111_p2)
}
   0x8   :  { %s115_s21 = scalar_lea.vmem %s16_s13, 256  ;;  %p120_p4 = scmp.lt.s32.totalorder %s16_s13, %s16_s13 }
   0x9   :  { %p116_p3 = scmp.ne.s32.totalorder %s16_s13, %s115_s21  ;;  %p121_p5 = scmp.lt.s32.totalorder %s115_s21, %s115_s21 }
   0xb   :  { %p122_p6 = por %p121_p5, %p120_p4 }
   0xd   :  { %p123_p7 = pnand %p122_p6, %p116_p3 }
   0xf   :  { %126 = shalt.err (!%p123_p7)
}
  0x10   :  { %s154_s22 = smov 128   ;;  %s155_s23 = smov 8  }
  0x11   :  { %21 = dma.hbm_to_vmem [thread:$0]  %s219_s0, 256, %s16_s13, [#allocation3], %s154_s22, %s154_s22, %s155_s23  }
  0x12   :  { %149 = dma.done.wait [#allocation3], 256  }
  0x13   :  { %150 = vsyncadd [#allocation3], 4294967040  ;;  %vm31_vm0 = vcmask 261120   ;;  %v29_v0 = vld [vmem:[#allocation2] sm:$0xff]  ;;  %v30_v1 = vld [vmem:[#allocation2 + $0x8] sm:$0xff]  ;;  %v65_v27 = vlaneseq  ;;  %s156_s29 = smov [#allocation5]  }
  0x14   :  { %v32_v2 = vsel %vm31_vm0, %v29_v0, 0.0  ;;  %v33_v3 = vsel %vm31_vm0, %v30_v1, 0.0  ;;  %v57_v29 = vld [vmem:[%s220_s1] sm:$0x1]  ;;  %s87_s30 = sshll.u32 %s156_s29, 4  ;;  %s88_s30 = int_to_ptr.vmem [resolvable:$true] %s87_s30 }
  0x15   :  { %v34_v4 = vadd.f32 %v33_v3, %v32_v2  ;;  %v66_v28 = vshrl.u32 %v65_v27, 7  ;;  %v61_v33 = vld [vmem:[%s221_s2] sm:$0x1]  ;;  %s127_s1 = scalar_lea.vmem %s88_s30, 256  ;;  %p132_p9 = scmp.lt.s32.totalorder %s88_s30, %s88_s30 }
  0x16   :  { %p128_p8 = scmp.ne.s32.totalorder %s88_s30, %s127_s1  ;;  %p133_p10 = scmp.lt.s32.totalorder %s127_s1, %s127_s1 }
  0x17   :  { %v35_v5 = vrot.slane %v34_v4, 4  ;;  %v67_v30 = vsub.s32 0, %v66_v28 }
  0x18   :  { %p134_p11 = por %p133_p10, %p132_p9 }
  0x19   :  { %v36_v6 = vadd.f32 %v35_v5, %v34_v4 }
  0x1a   :  { %p135_p12 = pnand %p134_p11, %p128_p8 }
  0x1b   :  { %v37_v7 = vrot.slane %v36_v6, 2 }
  0x1d   :  { %v38_v8 = vadd.f32 %v37_v7, %v36_v6 }
  0x1f   :  { %v39_v9 = vrot.slane %v38_v8, 1 }
  0x21   :  { %v40_v10 = vadd.f32 %v39_v9, %v38_v8 }
  0x23   :  { %v42_v11 = vmul.f32 0.0625, %v40_v10 }
  0x25   :  { %v43_v12 = vsub.f32 %v29_v0, %v42_v11  ;;  %v44_v13 = vsub.f32 %v30_v1, %v42_v11 }
  0x27   :  { %v45_v14 = vmul.f32 %v43_v12, %v43_v12  ;;  %v46_v15 = vmul.f32 %v44_v13, %v44_v13 }
  0x29   :  { %v47_v16 = vsel %vm31_vm0, %v45_v14, 0.0  ;;  %v48_v17 = vsel %vm31_vm0, %v46_v15, 0.0 }
  0x2a   :  { %v49_v18 = vadd.f32 %v48_v17, %v47_v16 }
  0x2c   :  { %v50_v19 = vrot.slane %v49_v18, 4 }
  0x2e   :  { %v51_v20 = vadd.f32 %v50_v19, %v49_v18 }
  0x30   :  { %v52_v21 = vrot.slane %v51_v20, 2 }
  0x32   :  { %v53_v22 = vadd.f32 %v52_v21, %v51_v20 }
  0x34   :  { %v54_v23 = vrot.slane %v53_v22, 1 }
  0x36   :  { %v55_v24 = vadd.f32 %v54_v23, %v53_v22 }
  0x38   :  { %v56_v25 = vmul.f32 0.0625, %v55_v24 }
  0x3a   :  { %v58_v26 = vadd.f32 1e-05, %v56_v25 }
  0x3c   :  { %103 = vrsqrt.f32 %v58_v26 }
  0x46   :  { %v104_v31 = vpop.eup %103 }
  0x47   :  { %v60_v32 = vmul.f32 %v104_v31, %v57_v29 }
  0x49   :  { %v62_v34 = vmul.f32 %v60_v32, %v42_v11  ;;  %v68_v35 = vrot.slane %v60_v32, %v67_v30 }
  0x4b   :  { %v63_v36 = vsub.f32 %v61_v33, %v62_v34  ;;  %v70_v37 = vmul.f32 %v68_v35, %v29_v0  ;;  %v71_v38 = vmul.f32 %v68_v35, %v30_v1 }
  0x4d   :  { %v76_v39 = vrot.slane %v63_v36, %v67_v30 }
  0x4f   :  { %v78_v40 = vadd.f32 %v76_v39, %v70_v37  ;;  %v79_v41 = vadd.f32 %v76_v39, %v71_v38 }
  0x51   :  { %80 = vst.msk [vmem:[#allocation5] sm:$0xff] %vm31_vm0, %v78_v40  ;;  %81 = vst.msk [vmem:[#allocation5 + $0x8] sm:$0xff] %vm31_vm0, %v79_v41 }
  0x52   :  { %138 = shalt.err (!%p135_p12)
}
  0x53   :  { %s139_s5 = scalar_lea.hbm %s222_s3, 256 }
  0x54   :  { %p140_p13 = scmp.ne.s32.totalorder %s222_s3, %s139_s5  ;;  %p143_p0 = scmp.lt.u32.totalorder %s139_s5, %s222_s3 }
  0x56   :  { %p145_p1 = pnand %p143_p0, %p140_p13 }
  0x58   :  { %148 = shalt.err (!%p145_p1)
}
  0x59   :  { %93 = dma.vmem_to_hbm [thread:$0]  %s88_s30, 256, %s222_s3, [#allocation4], %s154_s22, %s154_s22, %s155_s23  }
  0x5a   :  { %151 = dma.done.wait [#allocation4], 256  }
  0x5b   :  { %152 = vsyncadd [#allocation4], 4294967040 }
  0x5c   :  { %97 = vsyncpa [#allocation3], 1 }
  0x5d   :  { %98 = vsyncpa [#allocation4], 1 }

</bundles_post_ra>
